<compile_context>
chip_gen: v6e
topology: v6e:2x2x1
jax: 0.10.0
libtpu: 0.0.40
codegen_flags: <defaults>
</compile_context>

<pallas_src>
import math

import jax
import jax.numpy as jnp
from jax.experimental import pallas as pl
from jax.experimental.pallas import tpu as pltpu

_LANE = 128   # vreg lane width (last dim)
_SUB = 8      # vreg sublane width (second-to-last dim)


def _round_up(v, m):
    return (v + m - 1) // m * m


def _pad2(a, shape):
    return jnp.pad(a, [(0, s - d) for d, s in zip(a.shape, shape)])


def dbpgin_kernel(eps_ref, xk_ref, xi_ref, adj_ref,
                  wgt_ref, bgt_ref, w1_ref, b1_ref, w2_ref, b2_ref,
                  out_ref, acc_ref):
    k = pl.program_id(1)

    @pl.when(k == 0)
    def _init():
        # Self term (1 + eps) * h0[i] initializes the accumulator directly:
        # no separate zeros pass, and the finalize step stays short.
        h0_i = jnp.dot(xi_ref[...], wgt_ref[...],
                       preferred_element_type=jnp.float32)
        h0_i = jnp.maximum(h0_i + bgt_ref[...], 0.0)                  # (TM, GTp)
        acc_ref[...] = (1.0 + eps_ref[0]) * h0_i

    # --- DBPnet on the k-th column block: GT stand-in (linear) + ReLU ---
    # (in_dim is tiny, so recomputing this per row tile is negligible vs. the
    # adjacency matmul whose contraction dim is tk.)
    h0_k = jnp.dot(xk_ref[...], wgt_ref[...], preferred_element_type=jnp.float32)
    h0_k = jnp.maximum(h0_k + bgt_ref[...], 0.0)                      # (TK, GTp) f32

    # --- GIN neighbor sum: acc += A[i, k] @ h0[k]  (bf16 MXU, f32 accumulate) ---
    acc_ref[...] += jnp.dot(adj_ref[...], h0_k.astype(jnp.bfloat16),
                            preferred_element_type=jnp.float32)

    @pl.when(k == pl.num_programs(1) - 1)
    def _finalize():
        z = acc_ref[...]

        # --- GIN MLP: Linear -> ReLU -> Linear (lane-dense, padded to 128) ---
        h1 = jnp.dot(z, w1_ref[...], preferred_element_type=jnp.float32)
        h1 = jnp.maximum(h1 + b1_ref[...], 0.0)
        logits = jnp.dot(h1, w2_ref[...], preferred_element_type=jnp.float32)
        logits = logits + b2_ref[...]           # padded lanes carry -1e30 -> exp()==0

        # --- softmax over the (padded) last dim ---
        m = jnp.max(logits, axis=-1, keepdims=True)
        e = jnp.exp(logits - m)
        s = jnp.sum(e, axis=-1, keepdims=True)
        r = pl.reciprocal(s, approx=True)       # EUP vrcp (off the VPU critical path)
        r = r * (2.0 - s * r)                   # one Newton step -> ~full f32 accuracy
        out_ref[...] = e * r


def dbpgin_forward(x, edge_index, params, *, row_tile=256, col_tile=512):
    """x: (N, in_dim) f32, edge_index: (2, E) int32. Returns (N, out_dim) f32."""
    N, in_dim = x.shape
    gt_dim = params["w_gt"].shape[1]
    mid_dim = params["w1"].shape[1]
    out_dim = params["w2"].shape[1]

    # Lane-pad every feature dim to a multiple of 128.
    gt_p = _round_up(gt_dim, _LANE)
    mid_p = _round_up(mid_dim, _LANE)
    out_p = _round_up(out_dim, _LANE)

    # Node tiling: row tile (sublane-aligned), adjacency-column tile (lane-aligned).
    tm = min(row_tile, _round_up(N, _SUB))
    tk = min(col_tile, _round_up(N, _LANE))
    n_pad = _round_up(N, math.lcm(tm, tk))
    grid = (n_pad // tm, n_pad // tk)

    # Dense adjacency (glue, plain JAX): A[i, j] = #edges j -> i.
    # Stored in bf16: halves HBM/VMEM traffic of the dominant matmul and is
    # exact for multigraphs with <= 256 parallel edges.
    src, dst = edge_index[0], edge_index[1]
    adj = jnp.zeros((n_pad, n_pad), jnp.float32).at[dst, src].add(1.0)
    adj = adj.astype(jnp.bfloat16)

    x_p = _pad2(x, (n_pad, in_dim))
    wgt_p = _pad2(params["w_gt"], (in_dim, gt_p))
    bgt_p = _pad2(params["b_gt"], (1, gt_p))
    w1_p = _pad2(params["w1"], (gt_p, mid_p))
    b1_p = _pad2(params["b1"], (1, mid_p))
    w2_p = _pad2(params["w2"], (mid_p, out_p))
    # Padded logit lanes get a huge negative bias so softmax ignores them exactly.
    b2_p = jnp.pad(params["b2"], ((0, 0), (0, out_p - out_dim)),
                   constant_values=-1e30)

    const = lambda i, k: (0, 0)   # weights: DMA once, stay VMEM-resident

    out = pl.pallas_call(
        dbpgin_kernel,
        out_shape=jax.ShapeDtypeStruct((n_pad, out_p), jnp.float32),
        grid_spec=pltpu.PrefetchScalarGridSpec(
            num_scalar_prefetch=0,
            grid=grid,
            in_specs=[
                pl.BlockSpec(memory_space=pltpu.MemorySpace.SMEM),   # eps scalar
                pl.BlockSpec((tk, in_dim), lambda i, k: (k, 0)),     # x column block
                pl.BlockSpec((tm, in_dim), lambda i, k: (i, 0)),     # x row block (resident per i)
                pl.BlockSpec((tm, tk),     lambda i, k: (i, k)),     # adj tile (bf16)
                pl.BlockSpec((in_dim, gt_p), const),                 # W_gt
                pl.BlockSpec((1, gt_p),      const),                 # b_gt
                pl.BlockSpec((gt_p, mid_p),  const),                 # W1
                pl.BlockSpec((1, mid_p),     const),                 # b1
                pl.BlockSpec((mid_p, out_p), const),                 # W2
                pl.BlockSpec((1, out_p),     const),                 # b2
            ],
            out_specs=pl.BlockSpec((tm, out_p), lambda i, k: (i, 0)),
            scratch_shapes=[pltpu.VMEM((tm, gt_p), jnp.float32)],    # neighbor-sum acc
        ),
        compiler_params=pltpu.CompilerParams(
            dimension_semantics=("parallel", "arbitrary"),           # rows across TCs
            vmem_limit_bytes=48 * 1024 * 1024,                       # fits v7x's 64 MiB
        ),
    )(params["eps"], x_p, x_p, adj,
      wgt_p, bgt_p, w1_p, b1_p, w2_p, b2_p)

    return out[:N, :out_dim]


def reference_forward(x, edge_index, params):
    """Pure-JAX f32 reference of the same forward pass."""
    N = x.shape[0]
    src, dst = edge_index[0], edge_index[1]
    adj = jnp.zeros((N, N), jnp.float32).at[dst, src].add(1.0)
    h0 = jnp.maximum(x @ params["w_gt"] + params["b_gt"], 0.0)
    z = (1.0 + params["eps"][0]) * h0 + adj @ h0
    h1 = jnp.maximum(z @ params["w1"] + params["b1"], 0.0)
    logits = h1 @ params["w2"] + params["b2"]
    return jax.nn.softmax(logits, axis=-1)


if __name__ == "__main__":
    # Small shapes consistent with the module's __init__
    num_nodes, in_dim, hidden_dim, out_dim = 16, 8, 16, 8
    num_layers = 2
    gt_dim = num_layers * hidden_dim          # input dim of GIN's MLP
    mid_dim = 2 * out_dim

    key = jax.random.PRNGKey(0)
    ks = jax.random.split(key, 8)

    x = jax.random.normal(ks[0], (num_nodes, in_dim), jnp.float32)
    # deterministic synthetic edge list (ring + a few chords)
    src = jnp.arange(num_nodes, dtype=jnp.int32)
    dst = (src + 1) % num_nodes
    edge_index = jnp.concatenate(
        [jnp.stack([src, dst]), jnp.stack([dst, src]),
         jnp.stack([src, (src + 3) % num_nodes])], axis=1).astype(jnp.int32)

    params = {
        "eps":  jnp.zeros((1,), jnp.float32),  # train_eps=True, init 0
        "w_gt": 0.1 * jax.random.normal(ks[1], (in_dim, gt_dim), jnp.float32),
        "b_gt": 0.1 * jax.random.normal(ks[2], (1, gt_dim), jnp.float32),
        "w1":   0.1 * jax.random.normal(ks[3], (gt_dim, mid_dim), jnp.float32),
        "b1":   0.1 * jax.random.normal(ks[4], (1, mid_dim), jnp.float32),
        "w2":   0.1 * jax.random.normal(ks[5], (mid_dim, out_dim), jnp.float32),
        "b2":   0.1 * jax.random.normal(ks[6], (1, out_dim), jnp.float32),
    }

    out = dbpgin_forward(x, edge_index, params)
    out = jax.block_until_ready(out)

    ref = reference_forward(x, edge_index, params)
    assert out.shape == (num_nodes, out_dim)
    # Tolerance accounts for the bf16 neighbor-sum matmul (an intentional
    # optimization); observed error is ~1e-3 on these shapes.
    assert jnp.allclose(out, ref, atol=2e-2, rtol=2e-2), float(jnp.max(jnp.abs(out - ref)))
    assert jnp.allclose(jnp.sum(out, axis=-1), 1.0, atol=1e-5)

    print("KERNEL_OK")
</pallas_src>

<mosaic_0001>
module attributes {stable_mosaic.version = 11 : i64} {
  func.func @dbpgin_kernel(%arg0: i32, %arg1: i32, %arg2: memref<1xf32, #tpu.memory_space<smem>>, %arg3: memref<128x8xf32, #tpu.memory_space<vmem>>, %arg4: memref<16x8xf32, #tpu.memory_space<vmem>>, %arg5: memref<16x128xbf16, #tpu.memory_space<vmem>>, %arg6: memref<8x128xf32, #tpu.memory_space<vmem>>, %arg7: memref<1x128xf32, #tpu.memory_space<vmem>>, %arg8: memref<128x128xf32, #tpu.memory_space<vmem>>, %arg9: memref<1x128xf32, #tpu.memory_space<vmem>>, %arg10: memref<128x128xf32, #tpu.memory_space<vmem>>, %arg11: memref<1x128xf32, #tpu.memory_space<vmem>>, %arg12: memref<16x128xf32, #tpu.memory_space<vmem>>, %arg13: memref<16x128xf32, #tpu.memory_space<vmem>>) attributes {dimension_semantics = [#tpu.dimension_semantics<parallel>, #tpu.dimension_semantics<arbitrary>], iteration_bounds = array<i64: 8, 1>, scalar_prefetch = 0 : i64, scratch_operands = 1 : i64, tpu.core_type = #tpu.core_type<tc>, window_params = [{transform_indices = @transform_0, window_bounds = array<i64: 1>}, {transform_indices = @transform_1, window_bounds = array<i64: 128, 8>}, {transform_indices = @transform_2, window_bounds = array<i64: 16, 8>}, {transform_indices = @transform_3, window_bounds = array<i64: 16, 128>}, {pipeline_mode = #tpu.pipeline_mode<synchronous>, transform_indices = @transform_4, window_bounds = array<i64: 8, 128>}, {pipeline_mode = #tpu.pipeline_mode<synchronous>, transform_indices = @transform_5, window_bounds = array<i64: 1, 128>}, {pipeline_mode = #tpu.pipeline_mode<synchronous>, transform_indices = @transform_6, window_bounds = array<i64: 128, 128>}, {pipeline_mode = #tpu.pipeline_mode<synchronous>, transform_indices = @transform_7, window_bounds = array<i64: 1, 128>}, {pipeline_mode = #tpu.pipeline_mode<synchronous>, transform_indices = @transform_8, window_bounds = array<i64: 128, 128>}, {pipeline_mode = #tpu.pipeline_mode<synchronous>, transform_indices = @transform_9, window_bounds = array<i64: 1, 128>}, {transform_indices = @transform_10, window_bounds = array<i64: 16, 128>}]} {
    %c0_i32 = arith.constant 0 : i32
    %0 = arith.cmpi eq, %arg1, %c0_i32 : i32
    %1 = arith.extui %0 : i1 to i32
    %c0_i32_0 = arith.constant 0 : i32
    %2 = arith.cmpi ne, %1, %c0_i32_0 : i32
    scf.if %2 {
      %c0_16 = arith.constant 0 : index
      %c0_17 = arith.constant 0 : index
      %20 = vector.load %arg4[%c0_16, %c0_17] : memref<16x8xf32, #tpu.memory_space<vmem>>, vector<16x8xf32>
      %c0_18 = arith.constant 0 : index
      %c0_19 = arith.constant 0 : index
      %21 = vector.load %arg6[%c0_18, %c0_19] : memref<8x128xf32, #tpu.memory_space<vmem>>, vector<8x128xf32>
      %cst_20 = arith.constant dense<0.000000e+00> : vector<16x128xf32>
      %22 = tpu.matmul %20, %21, %cst_20 {dimension_numbers = #tpu.dot_dimension_numbers<[1], [0], [0], [1], [0, 0, 1, 1], [], []>} : vector<16x8xf32>, vector<8x128xf32>, vector<16x128xf32> -> vector<16x128xf32>
      %c0_21 = arith.constant 0 : index
      %c0_22 = arith.constant 0 : index
      %23 = vector.load %arg7[%c0_21, %c0_22] : memref<1x128xf32, #tpu.memory_space<vmem>>, vector<1x128xf32>
      %24 = vector.broadcast %23 : vector<1x128xf32> to vector<16x128xf32>
      %25 = arith.addf %22, %24 : vector<16x128xf32>
      %cst_23 = arith.constant 0.000000e+00 : f32
      %26 = vector.broadcast %cst_23 : f32 to vector<16x128xf32>
      %27 = arith.maximumf %25, %26 : vector<16x128xf32>
      %c0_24 = arith.constant 0 : index
      %28 = memref.load %arg2[%c0_24] : memref<1xf32, #tpu.memory_space<smem>>
      %cst_25 = arith.constant 1.000000e+00 : f32
      %29 = arith.addf %cst_25, %28 : f32
      %30 = vector.broadcast %29 : f32 to vector<16x128xf32>
      %31 = arith.mulf %30, %27 : vector<16x128xf32>
      %c0_26 = arith.constant 0 : index
      %c0_27 = arith.constant 0 : index
      %32 = vector.load %arg13[%c0_26, %c0_27] : memref<16x128xf32, #tpu.memory_space<vmem>>, vector<16x128xf32>
      tpu.vector_store %arg13[%c0_26, %c0_27], %31 {strides = array<i32>} : memref<16x128xf32, #tpu.memory_space<vmem>>, vector<16x128xf32>,
    } else {
    }
    %c0 = arith.constant 0 : index
    %c0_1 = arith.constant 0 : index
    %3 = vector.load %arg3[%c0, %c0_1] : memref<128x8xf32, #tpu.memory_space<vmem>>, vector<128x8xf32>
    %c0_2 = arith.constant 0 : index
    %c0_3 = arith.constant 0 : index
    %4 = vector.load %arg6[%c0_2, %c0_3] : memref<8x128xf32, #tpu.memory_space<vmem>>, vector<8x128xf32>
    %cst = arith.constant dense<0.000000e+00> : vector<128x128xf32>
    %5 = tpu.matmul %3, %4, %cst {dimension_numbers = #tpu.dot_dimension_numbers<[1], [0], [0], [1], [0, 0, 1, 1], [], []>} : vector<128x8xf32>, vector<8x128xf32>, vector<128x128xf32> -> vector<128x128xf32>
    %c0_4 = arith.constant 0 : index
    %c0_5 = arith.constant 0 : index
    %6 = vector.load %arg7[%c0_4, %c0_5] : memref<1x128xf32, #tpu.memory_space<vmem>>, vector<1x128xf32>
    %7 = vector.broadcast %6 : vector<1x128xf32> to vector<128x128xf32>
    %8 = arith.addf %5, %7 : vector<128x128xf32>
    %cst_6 = arith.constant 0.000000e+00 : f32
    %9 = vector.broadcast %cst_6 : f32 to vector<128x128xf32>
    %10 = arith.maximumf %8, %9 : vector<128x128xf32>
    %c0_7 = arith.constant 0 : index
    %c0_8 = arith.constant 0 : index
    %11 = vector.load %arg13[%c0_7, %c0_8] : memref<16x128xf32, #tpu.memory_space<vmem>>, vector<16x128xf32>
    %c0_9 = arith.constant 0 : index
    %c0_10 = arith.constant 0 : index
    %12 = vector.load %arg5[%c0_9, %c0_10] : memref<16x128xbf16, #tpu.memory_space<vmem>>, vector<16x128xbf16>
    %13 = arith.truncf %10 : vector<128x128xf32> to vector<128x128xbf16>
    %cst_11 = arith.constant dense<0.000000e+00> : vector<16x128xf32>
    %14 = tpu.matmul %12, %13, %cst_11 {dimension_numbers = #tpu.dot_dimension_numbers<[1], [0], [0], [1], [0, 0, 1, 1], [], []>} : vector<16x128xbf16>, vector<128x128xbf16>, vector<16x128xf32> -> vector<16x128xf32>
    %15 = arith.addf %11, %14 : vector<16x128xf32>
    %c0_12 = arith.constant 0 : index
    %c0_13 = arith.constant 0 : index
    %16 = vector.load %arg13[%c0_12, %c0_13] : memref<16x128xf32, #tpu.memory_space<vmem>>, vector<16x128xf32>
    tpu.vector_store %arg13[%c0_12, %c0_13], %15 {strides = array<i32>} : memref<16x128xf32, #tpu.memory_space<vmem>>, vector<16x128xf32>,
    %c0_i32_14 = arith.constant 0 : i32
    %17 = arith.cmpi eq, %arg1, %c0_i32_14 : i32
    %18 = arith.extui %17 : i1 to i32
    %c0_i32_15 = arith.constant 0 : i32
    %19 = arith.cmpi ne, %18, %c0_i32_15 : i32
    scf.if %19 {
      %c0_16 = arith.constant 0 : index
      %c0_17 = arith.constant 0 : index
      %20 = vector.load %arg13[%c0_16, %c0_17] : memref<16x128xf32, #tpu.memory_space<vmem>>, vector<16x128xf32>
      %c0_18 = arith.constant 0 : index
      %c0_19 = arith.constant 0 : index
      %21 = vector.load %arg8[%c0_18, %c0_19] : memref<128x128xf32, #tpu.memory_space<vmem>>, vector<128x128xf32>
      %cst_20 = arith.constant dense<0.000000e+00> : vector<16x128xf32>
      %22 = tpu.matmul %20, %21, %cst_20 {dimension_numbers = #tpu.dot_dimension_numbers<[1], [0], [0], [1], [0, 0, 1, 1], [], []>} : vector<16x128xf32>, vector<128x128xf32>, vector<16x128xf32> -> vector<16x128xf32>
      %c0_21 = arith.constant 0 : index
      %c0_22 = arith.constant 0 : index
      %23 = vector.load %arg9[%c0_21, %c0_22] : memref<1x128xf32, #tpu.memory_space<vmem>>, vector<1x128xf32>
      %24 = vector.broadcast %23 : vector<1x128xf32> to vector<16x128xf32>
      %25 = arith.addf %22, %24 : vector<16x128xf32>
      %cst_23 = arith.constant 0.000000e+00 : f32
      %26 = vector.broadcast %cst_23 : f32 to vector<16x128xf32>
      %27 = arith.maximumf %25, %26 : vector<16x128xf32>
      %c0_24 = arith.constant 0 : index
      %c0_25 = arith.constant 0 : index
      %28 = vector.load %arg10[%c0_24, %c0_25] : memref<128x128xf32, #tpu.memory_space<vmem>>, vector<128x128xf32>
      %cst_26 = arith.constant dense<0.000000e+00> : vector<16x128xf32>
      %29 = tpu.matmul %27, %28, %cst_26 {dimension_numbers = #tpu.dot_dimension_numbers<[1], [0], [0], [1], [0, 0, 1, 1], [], []>} : vector<16x128xf32>, vector<128x128xf32>, vector<16x128xf32> -> vector<16x128xf32>
      %c0_27 = arith.constant 0 : index
      %c0_28 = arith.constant 0 : index
      %30 = vector.load %arg11[%c0_27, %c0_28] : memref<1x128xf32, #tpu.memory_space<vmem>>, vector<1x128xf32>
      %31 = vector.broadcast %30 : vector<1x128xf32> to vector<16x128xf32>
      %32 = arith.addf %29, %31 : vector<16x128xf32>
      %cst_29 = arith.constant dense<0xFF800000> : vector<16xf32>
      %33 = vector.multi_reduction <maximumf>, %32, %cst_29 [1] : vector<16x128xf32> to vector<16xf32>
      %34 = vector.shape_cast %33 : vector<16xf32> to vector<16x1xf32>
      %35 = vector.broadcast %34 : vector<16x1xf32> to vector<16x128xf32>
      %36 = arith.subf %32, %35 : vector<16x128xf32>
      %37 = math.exp %36 : vector<16x128xf32>
      %cst_30 = arith.constant dense<0.000000e+00> : vector<16xf32>
      %38 = vector.multi_reduction <add>, %37, %cst_30 [1] : vector<16x128xf32> to vector<16xf32>
      %39 = vector.shape_cast %38 : vector<16xf32> to vector<16x1xf32>
      %40 = tpu.reciprocal %39 {approx = true} : vector<16x1xf32> -> vector<16x1xf32>
      %41 = arith.mulf %39, %40 : vector<16x1xf32>
      %cst_31 = arith.constant 2.000000e+00 : f32
      %42 = vector.broadcast %cst_31 : f32 to vector<16x1xf32>
      %43 = arith.subf %42, %41 : vector<16x1xf32>
      %44 = arith.mulf %40, %43 : vector<16x1xf32>
      %45 = vector.broadcast %44 : vector<16x1xf32> to vector<16x128xf32>
      %46 = arith.mulf %37, %45 : vector<16x128xf32>
      %c0_32 = arith.constant 0 : index
      %c0_33 = arith.constant 0 : index
      %47 = vector.load %arg12[%c0_32, %c0_33] : memref<16x128xf32, #tpu.memory_space<vmem>>, vector<16x128xf32>
      tpu.vector_store %arg12[%c0_32, %c0_33], %46 {strides = array<i32>} : memref<16x128xf32, #tpu.memory_space<vmem>>, vector<16x128xf32>,
    } else {
    }
    return
  }
  func.func @transform_0(%arg0: i32, %arg1: i32) -> i32 {
    %c0_i32 = arith.constant 0 : i32
    %c0_i32_0 = arith.constant 0 : i32
    return %c0_i32 : i32
  }
  func.func @transform_1(%arg0: i32, %arg1: i32) -> (i32, i32) {
    %c0_i32 = arith.constant 0 : i32
    %c0_i32_0 = arith.constant 0 : i32
    return %arg1, %c0_i32 : i32, i32
  }
  func.func @transform_2(%arg0: i32, %arg1: i32) -> (i32, i32) {
    %c0_i32 = arith.constant 0 : i32
    %c0_i32_0 = arith.constant 0 : i32
    return %arg0, %c0_i32 : i32, i32
  }
  func.func @transform_3(%arg0: i32, %arg1: i32) -> (i32, i32) {
    %c0_i32 = arith.constant 0 : i32
    return %arg0, %arg1 : i32, i32
  }
  func.func @transform_4(%arg0: i32, %arg1: i32) -> (i32, i32) {
    %c0_i32 = arith.constant 0 : i32
    %c0_i32_0 = arith.constant 0 : i32
    %c0_i32_1 = arith.constant 0 : i32
    return %c0_i32, %c0_i32_0 : i32, i32
  }
  func.func @transform_5(%arg0: i32, %arg1: i32) -> (i32, i32) {
    %c0_i32 = arith.constant 0 : i32
    %c0_i32_0 = arith.constant 0 : i32
    %c0_i32_1 = arith.constant 0 : i32
    return %c0_i32, %c0_i32_0 : i32, i32
  }
  func.func @transform_6(%arg0: i32, %arg1: i32) -> (i32, i32) {
    %c0_i32 = arith.constant 0 : i32
    %c0_i32_0 = arith.constant 0 : i32
    %c0_i32_1 = arith.constant 0 : i32
    return %c0_i32, %c0_i32_0 : i32, i32
  }
  func.func @transform_7(%arg0: i32, %arg1: i32) -> (i32, i32) {
    %c0_i32 = arith.constant 0 : i32
    %c0_i32_0 = arith.constant 0 : i32
    %c0_i32_1 = arith.constant 0 : i32
    return %c0_i32, %c0_i32_0 : i32, i32
  }
  func.func @transform_8(%arg0: i32, %arg1: i32) -> (i32, i32) {
    %c0_i32 = arith.constant 0 : i32
    %c0_i32_0 = arith.constant 0 : i32
    %c0_i32_1 = arith.constant 0 : i32
    return %c0_i32, %c0_i32_0 : i32, i32
  }
  func.func @transform_9(%arg0: i32, %arg1: i32) -> (i32, i32) {
    %c0_i32 = arith.constant 0 : i32
    %c0_i32_0 = arith.constant 0 : i32
    %c0_i32_1 = arith.constant 0 : i32
    return %c0_i32, %c0_i32_0 : i32, i32
  }
  func.func @transform_10(%arg0: i32, %arg1: i32) -> (i32, i32) {
    %c0_i32 = arith.constant 0 : i32
    %c0_i32_0 = arith.constant 0 : i32
    return %arg0, %c0_i32 : i32, i32
  }
}

</mosaic_0001>

<bundles_post_ra>
// kernel: tpu_custom_call.1
= control target key start
LH: loop header
LB: loop body
LE: loop exit
PB: predicated region body
PF: predicated region fallthrough
CT: control target
= control target key end

     0   :  { %s2039_s0 = inlined_call_operand.<no memory space> [shape: f32[1], index: 0, kind: input, shape index: {}]   ;;  %s2040_s1 = inlined_call_operand.vmem [shape: f32[128,8], index: 1, kind: input, shape index: {}]   ;;  %s2041_s2 = inlined_call_operand.vmem [shape: f32[128,8], index: 2, kind: input, shape index: {}]   ;;  %s2042_s3 = inlined_call_operand.hbm [shape: bf16[128,128], index: 3, kind: input, shape index: {}]   ;;  %s2043_s4 = inlined_call_operand.vmem [shape: f32[8,128], index: 4, kind: input, shape index: {}]   ;;  %s2044_s5 = inlined_call_operand.vmem [shape: f32[1,128], index: 5, kind: input, shape index: {}]   ;;  %s2045_s6 = inlined_call_operand.vmem [shape: f32[128,128], index: 6, kind: input, shape index: {}]   ;;  %s2046_s7 = inlined_call_operand.vmem [shape: f32[1,128], index: 7, kind: input, shape index: {}]   ;;  %s2047_s8 = inlined_call_operand.vmem [shape: f32[128,128], index: 8, kind: input, shape index: {}]   ;;  %s2048_s9 = inlined_call_operand.vmem [shape: f32[1,128], index: 9, kind: input, shape index: {}]   ;;  %s2049_s10 = inlined_call_operand.hbm [shape: f32[128,128], index: 10, kind: output, shape index: {}]  }
   0x1   :  { %15 = sst [smem:[#allocation3]] %s2039_s0 }
   0x2   :  { %16 = vsyncpa [#allocation5], 0 }
   0x3   :  { %18 = vsyncpa [#allocation5 + $0x1], 0 }
   0x4   :  { %19 = vsyncpa [#allocation6], 0 }
   0x5   :  { %21 = vsyncpa [#allocation6 + $0x1], 0  ;;  %s1678_s15 = smov 0   ;;  %s1680_s16 = smov 0  }
   0x6   :  { %s1682_s17 = smov 0   ;;  %s1684_s18 = smov 0  }
   0x7   :  { %s1686_s19 = smov 0   ;;  %s1688_s20 = smov 0  }
   0x8 LB: > { %2052 = sst [smem:[#allocation10_spill]] %s1606_s19  ;;  %s1196_s0 = sadd.s32 4294967295, %s1610_s20   ;;  %s1610_s20 = sphi %s1688_s20, %s27_s20   ;;  %s1606_s19 = sphi %s1686_s19, %s2062_s19   ;;  %s1602_s18 = sphi %s1684_s18, %s2061_s18   ;;  %s1598_s17 = sphi %s1682_s17, %s2065_s17   ;;  %s1594_s16 = sphi %s1680_s16, %s2064_s16   ;;  %s1590_s15 = sphi %s1678_s15, %s2063_s15  }
   0x9   : > { %s1197_s21 = sadd.s32 4294967294, %s1610_s20   ;;  %s39_s22 = sadd.s32 1, %s1606_s19 }
   0xa   : > { %s121_s23 = sadd.s32 1, %s1598_s17  ;;  %p41_p0 = scmp.ge.s32.totalorder %s39_s22, 8 }
   0xb   : > { %p128_p1 = scmp.ne.s32.totalorder %s1598_s17, %s1594_s16  ;;  %p129_p2 = scmp.eq.s32.totalorder %s1610_s20, 0 }
   0xc   : > { %p134_p3 = scmp.ne.s32.totalorder %s1594_s16, %s1590_s15  ;;  %s2067_s22 = smov (%p41_p0, %s39_s22), 0 }
   0xd   : > { %2053 = sst [smem:[#allocation11_spill]] %s2067_s22  ;;  %p1719_p4 = por %p129_p2, %p128_p1 }
   0xe   : > { %p135_p5 = scmp.eq.s32.totalorder %s1196_s0, 0  ;;  %s116_s25 = ssub.s32 %s1606_s19, %s2067_s22 }
   0xf   : > { %p284_p6 = scmp.eq.s32.totalorder %s1196_s0, 7  ;;  %p119_p7 = scmp.eq.s32.totalorder %s116_s25, 0 }
  0x10   : > { %p1725_p8 = por %p135_p5, %p134_p3  ;;  %p290_p10 = scmp.eq.s32.totalorder %s1197_s21, 7 }
  0x11   : > { %p1729_p9 = por %p284_p6, %p128_p1  ;;  %p1437_p12 = scmp.lt.s32.totalorder %s1610_s20, 8 }
  0x12   : > { %s1734_s28 = scalar_select %p119_p7, %s1598_s17, %s121_s23  }
  0x13   : > { %p1736_p11 = por %p290_p10, %p134_p3  ;;  %s349_s30 = sand.u32 1, %s1598_s17  }
  0x14   : > { %2057 = sst [smem:[#allocation12_spill]] %s1734_s28  ;;  %s1201_s11 = sshll.u32 %s349_s30, 3 }
  0x15   : > { %s1237_s12 = sshll.u32 %s1606_s19, 7  ;;  %s353_s25 = scalar_lea.vmem [#allocation4], %s1201_s11 }
  0x16   : > { %s360_s0 = scalar_lea.hbm %s2042_s3, %s1237_s12  ;;  %s361_s22 = sshll.u32 %s353_s25, 4  ;;  %s362_s22 = int_to_ptr.vmem [resolvable:$true] %s361_s22 }
  0x17   : > { %p1748_p13 = pnand %p1437_p12, %p1719_p4  ;;  %p1204_p0 = scmp.ge.s32.totalorder %s1610_s20, 1 }
  0x18   : > { %s350_s23 = scalar_lea.sflag [#allocation5], %s349_s30  ;;  %s1515_s28 = scalar_lea.vmem %s362_s22, 128 }
  0x19   : > { %p1504_p1 = pneg %p1748_p13  ;;  %p1516_p2 = scmp.ne.s32.totalorder %s362_s22, %s1515_s28 }
  0x1a   : > { %s1612_s19 = smov [#allocation4]  }
  0x1b   : > { %p1518_p3 = pnand %p1516_p2, %p1504_p1  ;;  %s1520_s13 = sshll.u32 %s1612_s19, 4  ;;  %s1521_s13 = int_to_ptr.vmem [resolvable:$false] %s1520_s13 }
  0x1c   : > { %s1522_s11 = scalar_lea.vmem %s1521_s13, 256  ;;  %p1523_p6 = scmp.lt.s32.totalorder %s362_s22, %s1521_s13 }
  0x1d   : > { %p1519_p5 = pneg %p1518_p3  ;;  %p1524_p7 = scmp.lt.s32.totalorder %s1522_s11, %s1515_s28 }
  0x1f   : > { %p1525_p10 = por %p1524_p7, %p1523_p6 }
  0x21   : > { %p1526_p4 = pnand %p1525_p10, %p1519_p5 }
  0x23   : > { %1529 = shalt.err (!%p1526_p4)
}
  0x24   : > { %s1613_s24 = smov 64   ;;  %s1614_s30 = smov 4  }
  0x25   : > { %1432 = dma.hbm_to_vmem [thread:$0]  (!%p1748_p13), %s360_s0, 128, %s362_s22, %s350_s23, %s1613_s24, %s1613_s24, %s1614_s30  }
  0x26   : > { %p369_p12 = scmp.lt.s32.totalorder %s1610_s20, 9 }
  0x28   : > { %p370_p1 = pnand %p1204_p0, %p369_p12 }
  0x29   : > { %s1761_s19 = sand.u32 (!%p370_p1), 1, %s1594_s16  }
  0x2a   : > { %373 = sbr.rel (%p370_p1) target bundleno = 1250 (0x4e2), region = 60  ;;  %s1205_s28 = sshll.u32 (!%p370_p1), %s1761_s19, 3 }
  0x2b   : > { %s376_s12 = scalar_lea.sflag (!%p370_p1), [#allocation5], %s1761_s19  ;;  %s1765_s14 = scalar_lea.vmem (!%p370_p1), [#allocation4], %s1205_s28 }
  0x2f   : > { %1581 = dma.done.wait (%p1725_p8), %s376_s12, 128  }
  0x30   : > { %1583 = vsyncadd (%p1725_p8), %s376_s12, 4294967168  ;;  %s1207_s22 = sshll.u32 %s1602_s18, 1  ;;  %vm455_vm0 = vcmask 64512   ;;  %v447_v0 = vld [vmem:[%s2043_s4] sm:$0xff]  ;;  %v547_v4 = vld [vmem:[%s2040_s1 + $0x8] sm:$0xff]  ;;  %v1615_v19 = vmov 0.0  }
  0x31   : > { %p433_p13 = scmp.lt.s32.totalorder %s1207_s22, 15  ;;  %1304 = vmatprep.subr.mxu1 %v447_v0  ;;  %v546_v3 = vld [vmem:[%s2040_s1] sm:$0xff]  ;;  %v548_v5 = vld [vmem:[%s2040_s1 + $0x10] sm:$0xff]  ;;  %v549_v6 = vld [vmem:[%s2040_s1 + $0x18] sm:$0xff]  ;;  %1335 = vmatprep.subr.bf16.mxu0 %v1615_v19  ;;  %vm1616_vm1 = vmmov 0   ;;  %s539_s12 = sld [smem:[#allocation3]] }
  0x32   : > { %1305 = vmatpush3.msra.mxu1 %v447_v0  ;;  %v550_v7 = vld [vmem:[%s2040_s1 + $0x20] sm:$0xff]  ;;  %v551_v8 = vld [vmem:[%s2040_s1 + $0x28] sm:$0xff]  ;;  %v552_v9 = vld [vmem:[%s2040_s1 + $0x30] sm:$0xff]  ;;  %1351 = vmatprep.mubr.msk.bf16.mxu0 %vm1616_vm1, %v1615_v19  ;;  %s1238_s25 = sshll.u32 %s1602_s18, 8  ;;  %s1073_s11 = scalar_lea.sflag [#allocation6], %s1761_s19 }
  0x33   : > { %s2069_s22 = smov (!%p433_p13, %s1207_s22), 15  ;;  %1309 = vmatprep.subr.mxu1 %v447_v0  ;;  %v553_v10 = vld [vmem:[%s2040_s1 + $0x38] sm:$0xff]  ;;  %v554_v11 = vld [vmem:[%s2040_s1 + $0x40] sm:$0xff]  ;;  %v555_v12 = vld [vmem:[%s2040_s1 + $0x48] sm:$0xff]  ;;  %s1990_s13 = scalar_lea.hbm %s2049_s10, %s1238_s25 }
  0x34   : > { %s1208_s0 = sshll.u32 %s2069_s22, 3  ;;  %v556_v13 = vld [vmem:[%s2040_s1 + $0x50] sm:$0xff]  ;;  %v557_v14 = vld [vmem:[%s2040_s1 + $0x58] sm:$0xff]  ;;  %v558_v15 = vld [vmem:[%s2040_s1 + $0x60] sm:$0xff]  ;;  %s1617_s18 = smov [#allocation7]  }
  0x35   : > { %s436_s23 = scalar_lea.vmem %s2041_s2, %s1208_s0  ;;  %v559_v16 = vld [vmem:[%s2040_s1 + $0x68] sm:$0xff]  ;;  %v560_v17 = vld [vmem:[%s2040_s1 + $0x70] sm:$0xff]  ;;  %v561_v18 = vld [vmem:[%s2040_s1 + $0x78] sm:$0xff]  ;;  %s1534_s24 = sshll.u32 %s1617_s18, 4  ;;  %s1535_s24 = int_to_ptr.vmem [resolvable:$false] %s1534_s24 }
  0x36   : > { %v445_v1 = vld [vmem:[%s436_s23] sm:$0xff]  ;;  %v446_v2 = vld [vmem:[%s436_s23 + $0x8] sm:$0xff]  ;;  %v863_v20 = vld [vmem:[%s2045_s6 + $0x78] sm:$0xff]  ;;  %s1536_s30 = scalar_lea.vmem %s1535_s24, 512 }
  0x37   : > { %1306 = vmatprep.mubr.msk.f32.mxu1 %vm455_vm0, %v445_v1  ;;  %v862_v21 = vld [vmem:[%s2045_s6 + $0x70] sm:$0xff]  ;;  %v861_v22 = vld [vmem:[%s2045_s6 + $0x68] sm:$0xff]  ;;  %v860_v23 = vld [vmem:[%s2045_s6 + $0x60] sm:$0xff]  ;;  %s540_s22 = sadd.f32 1.0, %s539_s12 }
  0x38   : > { %1307 = vmatmul.mubr.msk.f32.vlgmr.msra.gmra.mxu1 %vm455_vm0, %v446_v2  ;;  %v859_v24 = vld [vmem:[%s2045_s6 + $0x58] sm:$0xff]  ;;  %v858_v25 = vld [vmem:[%s2045_s6 + $0x50] sm:$0xff]  ;;  %v857_v26 = vld [vmem:[%s2045_s6 + $0x48] sm:$0xff] }
  0x39   : > { %1310 = vmatpush3.msra.mxu1 %v447_v0  ;;  %1311 = vmatprep.mubr.msk.f32.mxu1 %vm455_vm0, %v546_v3  ;;  %v856_v27 = vld [vmem:[%s2045_s6 + $0x40] sm:$0xff]  ;;  %v855_v28 = vld [vmem:[%s2045_s6 + $0x38] sm:$0xff]  ;;  %v854_v29 = vld [vmem:[%s2045_s6 + $0x30] sm:$0xff] }
  0x3a   : > { %1355 = vmatprep.subr.mxu1 %v863_v20  ;;  %v853_v30 = vld [vmem:[%s2045_s6 + $0x28] sm:$0xff]  ;;  %v852_v31 = vld [vmem:[%s2045_s6 + $0x20] sm:$0xff]  ;;  %v851_v32 = vld [vmem:[%s2045_s6 + $0x18] sm:$0xff] }
  0x3b   : > { %v1888_v33 = vld [vmem:[%s2044_s5] ss:$0 sm:$0xff] }
  0x3c   : > { %1312 = vmatmul.mubr.msk.f32.vlgmr.msra.gmra.mxu1 %vm455_vm0, %v547_v4 }
  0x3d   : > { %1314 = vmatprep.mubr.msk.f32.mxu1 %vm455_vm0, %v548_v5  ;;  %1356 = vmatpush3.msra.mxu1 %v863_v20 }
  0x3e   : > { %1357 = vmatprep.subr.mxu1 %v862_v21 }
  0x3f   : > { %1358 = vmatpush3.msra.mxu1 %v862_v21 }
  0x40   : > { %1315 = vmatmul.mubr.msk.f32.gmra.mxu1 %vm455_vm0, %v549_v6  ;;  %1359 = vmatprep.subr.mxu1 %v861_v22 }
  0x41   : > { %1317 = vmatprep.mubr.msk.f32.mxu1 %vm455_vm0, %v550_v7  ;;  %1360 = vmatpush3.msra.mxu1 %v861_v22 }
  0x42   : > { %1361 = vmatprep.subr.mxu1 %v860_v23 }
  0x43   : > { %1362 = vmatpush3.msra.mxu1 %v860_v23 }
  0x44   : > { %1318 = vmatmul.mubr.msk.f32.gmra.mxu1 %vm455_vm0, %v551_v8  ;;  %1363 = vmatprep.subr.mxu1 %v859_v24 }
  0x45   : > { %1320 = vmatprep.mubr.msk.f32.mxu1 %vm455_vm0, %v552_v9  ;;  %1364 = vmatpush3.msra.mxu1 %v859_v24 }
  0x46   : > { %1365 = vmatprep.subr.mxu1 %v858_v25 }
  0x47   : > { %1366 = vmatpush3.msra.mxu1 %v858_v25 }
  0x48   : > { %1321 = vmatmul.mubr.msk.f32.gmra.mxu1 %vm455_vm0, %v553_v10  ;;  %1367 = vmatprep.subr.mxu1 %v857_v26 }
  0x49   : > { %1323 = vmatprep.mubr.msk.f32.mxu1 %vm455_vm0, %v554_v11  ;;  %1368 = vmatpush3.msra.mxu1 %v857_v26 }
  0x4a   : > { %1369 = vmatprep.subr.mxu1 %v856_v27 }
  0x4b   : > { %1370 = vmatpush3.msra.mxu1 %v856_v27 }
  0x4c   : > { %1324 = vmatmul.mubr.msk.f32.gmra.mxu1 %vm455_vm0, %v555_v12  ;;  %1371 = vmatprep.subr.mxu1 %v855_v28 }
  0x4d   : > { %1326 = vmatprep.mubr.msk.f32.mxu1 %vm455_vm0, %v556_v13  ;;  %1372 = vmatpush3.msra.mxu1 %v855_v28 }
  0x4e   : > { %1373 = vmatprep.subr.mxu1 %v854_v29 }
  0x4f   : > { %1374 = vmatpush3.msra.mxu1 %v854_v29 }
  0x50   : > { %1327 = vmatmul.mubr.msk.f32.gmra.mxu1 %vm455_vm0, %v557_v14  ;;  %1375 = vmatprep.subr.mxu1 %v853_v30 }
  0x51   : > { %1329 = vmatprep.mubr.msk.f32.mxu1 %vm455_vm0, %v558_v15  ;;  %1376 = vmatpush3.msra.mxu1 %v853_v30 }
  0x52   : > { %1377 = vmatprep.subr.mxu1 %v852_v31 }
  0x53   : > { %1378 = vmatpush3.msra.mxu1 %v852_v31  ;;  %v1493_v31 = vld [vmem:[%s1765_s14] sm:$0xff]  }
  0x54   : > { %1330 = vmatmul.mubr.msk.f32.gmra.mxu1 %vm455_vm0, %v559_v16  ;;  %1379 = vmatprep.subr.mxu1 %v851_v32 }
  0x55   : > { %1332 = vmatprep.mubr.msk.f32.mxu1 %vm455_vm0, %v560_v17  ;;  %1380 = vmatpush3.msra.mxu1 %v851_v32  ;;  %v850_v32 = vld [vmem:[%s2045_s6 + $0x10] sm:$0xff] }
  0x56   : > { %1381 = vmatprep.subr.mxu1 %v850_v32 }
  0x57   : > { %1382 = vmatpush3.msra.mxu1 %v850_v32 }
  0x58   : > { %1333 = vmatmul.mubr.msk.f32.gmra.mxu1 %vm455_vm0, %v561_v18 }
  0xf8   : > { %v1308_v34 = vpop.f32.mrf.mxu1 }
  0xf9   : > { %v1891_v35 = vadd.f32 %v1308_v34, %v1888_v33  ;;  %v963_v34 = vld [vmem:[%s2047_s8 + $0x78] sm:$0xff] }
  0xfa   : > { %v528_v36 = vpop.f32.mrf.mxu1 }
  0xfb   : > { %v1894_v37 = vadd.f32 %v1888_v33, %v528_v36  ;;  %v962_v36 = vld [vmem:[%s2047_s8 + $0x70] sm:$0xff] }
  0xfc   : > { %v1313_v38 = vpop.f32.mrf.mxu1 }
  0xfd   : > { %v691_v25 = vadd.f32 %v1313_v38, %v1888_v33  ;;  %v961_v38 = vld [vmem:[%s2047_s8 + $0x68] sm:$0xff] }
  0xfe   : > { %v685_v39 = vpop.f32.mrf.mxu1 }
  0xff   : > { %v686_v22 = vadd.f32 %v1888_v33, %v685_v39  ;;  %v765_v29 = vmax.f32 %v691_v25, 0.0  ;;  %v960_v39 = vld [vmem:[%s2047_s8 + $0x60] sm:$0xff] }
 0x100   : > { %v1316_v40 = vpop.f32.mrf.mxu1 }
 0x101   : > { %v701_v20 = vadd.f32 %v1316_v40, %v1888_v33  ;;  %v764_v27 = vmax.f32 %v686_v22, 0.0  ;;  %v959_v40 = vld [vmem:[%s2047_s8 + $0x58] sm:$0xff] }
 0x102   : > { %v695_v41 = vpop.f32.mrf.mxu1 }
 0x103   : > { %v696_v16 = vadd.f32 %v1888_v33, %v695_v41  ;;  %v767_v26 = vmax.f32 %v701_v20, 0.0  ;;  %v784_v30 = vpack.c.bf16 %v765_v29, %v764_v27  ;;  %v958_v41 = vld [vmem:[%s2047_s8 + $0x50] sm:$0xff] }
 0x104   : > { %v1319_v42 = vpop.f32.mrf.mxu1 }
 0x105   : > { %v711_v14 = vadd.f32 %v1319_v42, %v1888_v33  ;;  %v766_v23 = vmax.f32 %v696_v16, 0.0  ;;  %v957_v42 = vld [vmem:[%s2047_s8 + $0x48] sm:$0xff] }
 0x106   : > { %v705_v43 = vpop.f32.mrf.mxu1 }
 0x107   : > { %v706_v11 = vadd.f32 %v1888_v33, %v705_v43  ;;  %v769_v21 = vmax.f32 %v711_v14, 0.0  ;;  %v785_v28 = vpack.c.bf16 %v767_v26, %v766_v23  ;;  %v956_v43 = vld [vmem:[%s2047_s8 + $0x40] sm:$0xff] }
 0x108   : > { %v1322_v44 = vpop.f32.mrf.mxu1 }
 0x109   : > { %v721_v9 = vadd.f32 %v1322_v44, %v1888_v33  ;;  %v768_v17 = vmax.f32 %v706_v11, 0.0  ;;  %v955_v44 = vld [vmem:[%s2047_s8 + $0x38] sm:$0xff] }
 0x10a   : > { %v715_v45 = vpop.f32.mrf.mxu1 }
 0x10b   : > { %v716_v6 = vadd.f32 %v1888_v33, %v715_v45  ;;  %v771_v15 = vmax.f32 %v721_v9, 0.0  ;;  %v786_v24 = vpack.c.bf16 %v769_v21, %v768_v17  ;;  %v954_v45 = vld [vmem:[%s2047_s8 + $0x30] sm:$0xff] }
 0x10c   : > { %v1325_v46 = vpop.f32.mrf.mxu1 }
 0x10d   : > { %v731_v4 = vadd.f32 %v1325_v46, %v1888_v33  ;;  %v770_v12 = vmax.f32 %v716_v6, 0.0  ;;  %v953_v46 = vld [vmem:[%s2047_s8 + $0x28] sm:$0xff] }
 0x10e   : > { %v725_v47 = vpop.f32.mrf.mxu1 }
 0x10f   : > { %v726_v1 = vadd.f32 %v1888_v33, %v725_v47  ;;  %v773_v10 = vmax.f32 %v731_v4, 0.0  ;;  %v787_v18 = vpack.c.bf16 %v771_v15, %v770_v12  ;;  %v952_v47 = vld [vmem:[%s2047_s8 + $0x20] sm:$0xff] }
 0x110   : > { %v1328_v48 = vpop.f32.mrf.mxu1 }
 0x111   : > { %v741_v63 = vadd.f32 %v1328_v48, %v1888_v33  ;;  %v772_v7 = vmax.f32 %v726_v1, 0.0  ;;  %v537_v48 = vmax.f32 %v1894_v37, 0.0  ;;  %v949_v37 = vld [vmem:[%s2047_s8 + $0x8] sm:$0xff] }
 0x112   : > { %v735_v49 = vpop.f32.mrf.mxu1 }
 0x113   : > { %v736_v60 = vadd.f32 %v1888_v33, %v735_v49  ;;  %v775_v5 = vmax.f32 %v741_v63, 0.0  ;;  %v788_v13 = vpack.c.bf16 %v773_v10, %v772_v7  ;;  %v541_v49 = vstv %s540_s22  ;;  %s1206_s22 = sshll.u32 %s1761_s19, 4 }
 0x114   : > { %v1331_v50 = vpop.f32.mrf.mxu1  ;;  %s425_s14 = scalar_lea.vmem [#allocation7], %s1206_s22 }
 0x115   : > { %v751_v57 = vadd.f32 %v1331_v50, %v1888_v33  ;;  %v774_v2 = vmax.f32 %v736_v60, 0.0  ;;  %v538_v50 = vmax.f32 %v1891_v35, 0.0  ;;  %v950_v35 = vld [vmem:[%s2047_s8 + $0x10] sm:$0xff]  ;;  %v948_v60 = vld [vmem:[%s2047_s8] sm:$0xff]  ;;  %s1086_s0 = sshll.u32 %s425_s14, 4  ;;  %s1992_s0 = int_to_ptr.vmem [resolvable:$true] %s1086_s0 }
 0x116   : > { %v745_v51 = vpop.f32.mrf.mxu1  ;;  %s1530_s26 = scalar_lea.vmem %s1992_s0, 256  ;;  %p1537_p3 = scmp.lt.s32.totalorder %s1992_s0, %s1535_s24 }
 0x117   : > { %v746_v55 = vadd.f32 %v1888_v33, %v745_v51  ;;  %v777_v0 = vmax.f32 %v751_v57, 0.0  ;;  %v789_v8 = vpack.c.bf16 %v775_v5, %v774_v2  ;;  %v542_v51 = vmul.f32 %v541_v49, %v537_v48  ;;  %v1231_v5 = vld [vmem:[%s2048_s9] ss:$0 sm:$0xff]  ;;  %p1531_p8 = scmp.ne.s32.totalorder %s1992_s0, %s1530_s26  ;;  %p1538_p5 = scmp.lt.s32.totalorder %s1536_s30, %s1530_s26 }
 0x118   : > { %v1334_v52 = vpop.f32.mrf.mxu1 }
 0x119   : > { %v761_v53 = vadd.f32 %v1334_v52, %v1888_v33  ;;  %v776_v61 = vmax.f32 %v746_v55, 0.0  ;;  %v543_v55 = vmul.f32 %v541_v49, %v538_v50  ;;  %p1532_p0 = pnand %p1531_p8, %p1729_p9  ;;  %p1539_p6 = por %p1538_p5, %p1537_p3 }
 0x11a   : > { %v755_v54 = vpop.f32.mrf.mxu1 }
 0x11b   : > { %v756_v56 = vadd.f32 %v1888_v33, %v755_v54  ;;  %v779_v58 = vmax.f32 %v761_v53, 0.0  ;;  %v790_v3 = vpack.c.bf16 %v777_v0, %v776_v61  ;;  %v849_v33 = vld [vmem:[%s2045_s6 + $0x8] sm:$0xff]  ;;  %v1230_v61 = vld [vmem:[%s2046_s7] ss:$0 sm:$0xff]  ;;  %p1533_p2 = pneg %p1532_p0 }
 0x11c   : > { %1383 = vmatprep.subr.mxu1 %v849_v33 }
 0x11d   : > { %v778_v59 = vmax.f32 %v756_v56, 0.0  ;;  %1384 = vmatpush3.msra.mxu1 %v849_v33  ;;  %p1540_p7 = pnand %p1539_p6, %p1533_p2 }
 0x11f   : > { %v791_v62 = vpack.c.bf16 %v779_v58, %v778_v59  ;;  %v951_v59 = vld [vmem:[%s2047_s8 + $0x18] sm:$0xff] }
 0x121   : > { %1336 = vmatpush3.bf16.msra.mxu0 %v791_v62 }
 0x122   : > { %1337 = vmatprep.subr.bf16.mxu0 %v1615_v19 }
 0x125   : > { %1338 = vmatpush3.bf16.msra.mxu0 %v790_v3 }
 0x126   : > { %1339 = vmatprep.subr.bf16.mxu0 %v1615_v19 }
 0x129   : > { %1340 = vmatpush3.bf16.msra.mxu0 %v789_v8 }
 0x12a   : > { %1341 = vmatprep.subr.bf16.mxu0 %v1615_v19 }
 0x12d   : > { %1342 = vmatpush3.bf16.msra.mxu0 %v788_v13 }
 0x12e   : > { %1343 = vmatprep.subr.bf16.mxu0 %v1615_v19 }
 0x131   : > { %1344 = vmatpush3.bf16.msra.mxu0 %v787_v18 }
 0x132   : > { %1345 = vmatprep.subr.bf16.mxu0 %v1615_v19 }
 0x135   : > { %1346 = vmatpush3.bf16.msra.mxu0 %v786_v24 }
 0x136   : > { %1347 = vmatprep.subr.bf16.mxu0 %v1615_v19 }
 0x139   : > { %1348 = vmatpush3.bf16.msra.mxu0 %v785_v28 }
 0x13a   : > { %1349 = vmatprep.subr.bf16.mxu0 %v1615_v19  ;;  %v848_v19 = vld [vmem:[%s2045_s6] sm:$0xff] }
 0x13b   : > { %1385 = vmatprep.subr.mxu1 %v848_v19 }
 0x13c   : > { %1386 = vmatpush3.msra.mxu1 %v848_v19 }
 0x13d   : > { %1350 = vmatpush3.bf16.msra.mxu0 %v784_v30 }
 0x13e   : > { %1390 = vmatprep.subr.mxu0 %v963_v34 }
 0x140   : > { %1352 = vmatmul.mubr.bf16.vlgmr.msra.gmra.mxu0 %v1493_v31 }
 0x141   : > { %1391 = vmatpush3.msra.mxu0 %v963_v34 }
 0x142   : > { %1392 = vmatprep.subr.mxu0 %v962_v36 }
 0x143   : > { %1393 = vmatpush3.msra.mxu0 %v962_v36 }
 0x144   : > { %1394 = vmatprep.subr.mxu0 %v961_v38 }
 0x145   : > { %1395 = vmatpush3.msra.mxu0 %v961_v38 }
 0x146   : > { %1396 = vmatprep.subr.mxu0 %v960_v39 }
 0x147   : > { %1397 = vmatpush3.msra.mxu0 %v960_v39 }
 0x148   : > { %1398 = vmatprep.subr.mxu0 %v959_v40 }
 0x149   : > { %1399 = vmatpush3.msra.mxu0 %v959_v40 }
 0x14a   : > { %1400 = vmatprep.subr.mxu0 %v958_v41 }
 0x14b   : > { %1401 = vmatpush3.msra.mxu0 %v958_v41 }
 0x14c   : > { %1402 = vmatprep.subr.mxu0 %v957_v42 }
 0x14d   : > { %1403 = vmatpush3.msra.mxu0 %v957_v42 }
 0x14e   : > { %1404 = vmatprep.subr.mxu0 %v956_v43 }
 0x14f   : > { %1405 = vmatpush3.msra.mxu0 %v956_v43 }
 0x150   : > { %1406 = vmatprep.subr.mxu0 %v955_v44 }
 0x151   : > { %1407 = vmatpush3.msra.mxu0 %v955_v44 }
 0x152   : > { %1408 = vmatprep.subr.mxu0 %v954_v45 }
 0x153   : > { %1409 = vmatpush3.msra.mxu0 %v954_v45 }
 0x154   : > { %1410 = vmatprep.subr.mxu0 %v953_v46 }
 0x155   : > { %1411 = vmatpush3.msra.mxu0 %v953_v46 }
 0x156   : > { %1412 = vmatprep.subr.mxu0 %v952_v47 }
 0x157   : > { %1413 = vmatpush3.msra.mxu0 %v952_v47 }
 0x158   : > { %1414 = vmatprep.subr.mxu0 %v951_v59 }
 0x159   : > { %1415 = vmatpush3.msra.mxu0 %v951_v59 }
 0x15a   : > { %1416 = vmatprep.subr.mxu0 %v950_v35 }
 0x15b   : > { %1417 = vmatpush3.msra.mxu0 %v950_v35 }
 0x15c   : > { %1418 = vmatprep.subr.mxu0 %v949_v37 }
 0x15d   : > { %1419 = vmatpush3.msra.mxu0 %v949_v37 }
 0x15e   : > { %1420 = vmatprep.subr.mxu0 %v948_v60 }
 0x15f   : > { %1421 = vmatpush3.msra.mxu0 %v948_v60 }
 0x200   : > { %v832_v52 = vpop.f32.mrf.mxu0 }
 0x201   : > { %v839_v53 = vadd.f32 %v832_v52, %v542_v51 }
 0x202   : > { %v1353_v54 = vpop.f32.mrf.mxu0 }
 0x203   : > { %1387 = vmatprep.mubr.f32.mxu1 %v839_v53 }
 0x204   : > { %v835_v56 = vpop.f32.mrf.mxu0 }
 0x205   : > { %v840_v57 = vadd.f32 %v835_v56, %v543_v55 }
 0x206   : > { %v1354_v58 = vpop.f32.mrf.mxu0 }
 0x207   : > { %1388 = vmatmul.mubr.f32.vlgmr.msra.gmra.mxu1 %v840_v57 }
 0x2c7   : > { %v1389_v62 = vpop.f32.mrf.mxu1 }
 0x2c8   : > { %v943_v63 = vadd.f32 %v1389_v62, %v1230_v61 }
 0x2c9   : > { %v937_v0 = vpop.f32.mrf.mxu1 }
 0x2ca   : > { %v938_v1 = vadd.f32 %v1230_v61, %v937_v0  ;;  %v947_v3 = vmax.f32 %v943_v63, 0.0 }
 0x2cc   : > { %v946_v2 = vmax.f32 %v938_v1, 0.0 }
 0x2ce   : > { %1422 = vmatprep.mubr.f32.mxu0 %v946_v2 }
 0x2cf   : > { %1423 = vmatmul.mubr.f32.vlgmr.msra.gmra.mxu0 %v947_v3 }
 0x38f   : > { %v1424_v4 = vpop.f32.mrf.mxu0 }
 0x390   : > { %v1043_v8 = vadd.f32 %v1424_v4, %v1231_v5 }
 0x391   : > { %v1037_v6 = vpop.f32.mrf.mxu0 }
 0x392   : > { %v1038_v7 = vadd.f32 %v1231_v5, %v1037_v6 }
 0x394   : > { %1046 = vmax.xlane.f32.xlu0 %v1038_v7 }
 0x398   : > { %1048 = vmax.xlane.f32.xlu0 %v1043_v8 }
 0x41d   : > { %v1047_v9 = vpop.xlane.xlu0 %1046 }
 0x41e   : > { %v1050_v10 = vsub.f32 %v1038_v7, %v1047_v9 }
 0x420   : > { %v1052_v11 = vmul.f32 1.442695, %v1050_v10 }
 0x421   : > { %v1049_v12 = vpop.xlane.xlu0 %1048 }
 0x422   : > { %1494 = vpow2.f32 %v1052_v11  ;;  %v1051_v13 = vsub.f32 %v1043_v8, %v1049_v12 }
 0x424   : > { %v1054_v14 = vmul.f32 1.442695, %v1051_v13 }
 0x426   : > { %1496 = vpow2.f32 %v1054_v14 }
 0x42f   : > { %v1495_v15 = vpop.eup %1494 }
 0x430   : > { %1056 = vadd.xlane.f32.xlu1 %v1495_v15 }
 0x433   : > { %v1497_v16 = vpop.eup %1496 }
 0x434   : > { %1058 = vadd.xlane.f32.xlu1 %v1497_v16 }
 0x4b9   : > { %v1057_v17 = vpop.xlane.xlu1 %1056 }
 0x4ba   : > { %1498 = vrcp.f32 %v1057_v17 }
 0x4bd   : > { %v1059_v18 = vpop.xlane.xlu1 %1058 }
 0x4be   : > { %1500 = vrcp.f32 %v1059_v18 }
 0x4c7   : > { %v1499_v20 = vpop.eup %1498 }
 0x4c8   : > { %v1062_v21 = vmul.f32 %v1499_v20, %v1057_v17 }
 0x4ca   : > { %v1064_v22 = vsub.f32 2.0, %v1062_v21 }
 0x4cb   : > { %v1501_v23 = vpop.eup %1500 }
 0x4cc   : > { %v1066_v24 = vmul.f32 %v1499_v20, %v1064_v22  ;;  %v1063_v25 = vmul.f32 %v1501_v23, %v1059_v18 }
 0x4ce   : > { %v1068_v26 = vmul.f32 %v1495_v15, %v1066_v24  ;;  %v1065_v27 = vsub.f32 2.0, %v1063_v25 }
 0x4d0   : > { %1070 = vst [vmem:[%s425_s14] sm:$0xff] %v1068_v26  ;;  %v1067_v28 = vmul.f32 %v1501_v23, %v1065_v27 }
 0x4d2   : > { %v1069_v29 = vmul.f32 %v1497_v16, %v1067_v28 }
 0x4d4   : > { %1071 = vst [vmem:[%s425_s14 + $0x8] sm:$0xff] %v1069_v29 }
 0x4d5   : > { %1543 = shalt.err (!%p1540_p7)
}
 0x4d6   : > { %s1544_s28 = scalar_lea.hbm %s1990_s13, 256  ;;  %s1548_s14 = scalar_lea.hbm %s2049_s10, 2048 }
 0x4d7   : > { %p1545_p10 = scmp.ne.s32.totalorder %s1990_s13, %s1544_s28  ;;  %p1549_p1 = scmp.lt.s32.totalorder %s1990_s13, %s2049_s10 }
 0x4d8   : > { %p1550_p13 = scmp.lt.s32.totalorder %s1548_s14, %s1544_s28 }
 0x4d9   : > { %p1546_p4 = pnand %p1545_p10, %p1729_p9 }
 0x4da   : > { %p1551_p8 = por %p1550_p13, %p1549_p1 }
 0x4db   : > { %p1547_p12 = pneg %p1546_p4 }
 0x4dd   : > { %p1552_p0 = pnand %p1551_p8, %p1547_p12 }
 0x4df   : > { %1555 = shalt.err (!%p1552_p0)
}
 0x4e0   : > { %s1618_s23 = smov 128   ;;  %s1619_s26 = smov 8  }
 0x4e1   : > { %1427 = dma.vmem_to_hbm [thread:$0]  (%p1729_p9), %s1992_s0, 256, %s1990_s13, %s1073_s11, %s1618_s23, %s1618_s23, %s1619_s26  }
 0x4e2 PF: > { %p1438_p2 = scmp.ge.s32.totalorder %s1610_s20, 2  ;;  %s1101_s18 = sand.u32 1, %s1590_s15  }
 0x4e3   : > { %s1102_s24 = scalar_lea.sflag [#allocation6], %s1101_s18 }
 0x4e4   : > { %p1434_p3 = pnand %p1438_p2, %p1736_p11 }
 0x4e6   : > { %p1435_p5 = pneg %p1434_p3 }
 0x4e8   : > { %1585 = dma.done.wait (%p1435_p5), %s1102_s24, 256  }
 0x4e9   : > { %1587 = vsyncadd (%p1435_p5), %s1102_s24, 4294967040  ;;  %s27_s20 = sadd.s32 1, %s1610_s20   ;;  %s2060_s27 = sld [smem:[#allocation12_spill]] }
 0x4ea   : > { %p24_p6 = scmp.ge.s32.totalorder %s27_s20, 10   ;;  %s2061_s18 = sld [smem:[#allocation10_spill]] }
 0x4eb   : > { %s2062_s19 = sld [smem:[#allocation11_spill]]  ;;  %s2063_s15 = smov %s1594_s16 }
 0x4ec   : > { %s2064_s16 = smov %s1598_s17  ;;  %26 = sbr.rel (!%p24_p6) target bundleno = 8 (0x8), region = 119 }
 0x4ef   : > { %s2065_s17 = smov %s2060_s27 }
 0x4f1   :  { %1107 = vsyncpa [#allocation5], 1 }
 0x4f2   :  { %1109 = vsyncpa [#allocation5 + $0x1], 1 }
 0x4f3   :  { %1110 = vsyncpa [#allocation6], 1 }
 0x4f4   :  { %1112 = vsyncpa [#allocation6 + $0x1], 1 }

</bundles_post_ra>
